<compile_context>
chip_gen: v7x
topology: tpu7x:2x2x1
jax: 0.10.0
libtpu: 0.0.40
codegen_flags: <defaults>
</compile_context>

<pallas_src>
import math
from functools import partial

import jax
import jax.numpy as jnp
from jax import lax
from jax.experimental import pallas as pl
from jax.experimental.pallas import tpu as pltpu


# ----------------------------------------------------------------------------
# helpers
# ----------------------------------------------------------------------------
_VMEM_LIMIT = 32 * 1024 * 1024  # fits v5e/v6e (128 MiB phys) and v7x (64 MiB phys)


def _fit(dim, target):
    """Largest divisor of `dim` that is <= target (bounds the block size)."""
    # TODO(synk): for ragged dims (e.g. prime S) switch to pl.cdiv grids + in-kernel masking.
    t = max(1, min(dim, target))
    while dim % t != 0:
        t -= 1
    return t


def _rotate_half(x):
    # reference-only helper (kernel path computes RoPE per-half directly)
    half = x.shape[-1] // 2
    return jnp.concatenate([-x[..., half:], x[..., :half]], axis=-1)


# ----------------------------------------------------------------------------
# Kernel 1: tiled matmul with f32 VMEM accumulator (fused QKV projection + o_proj).
# Weights are stored pre-transposed as (in_features, out_features).
# ----------------------------------------------------------------------------
def _matmul_kernel(x_ref, w_ref, o_ref, acc_ref):
    @pl.when(pl.program_id(2) == 0)
    def _():
        acc_ref[...] = jnp.zeros_like(acc_ref)

    acc_ref[...] += jnp.dot(x_ref[...], w_ref[...],
                            preferred_element_type=jnp.float32)

    @pl.when(pl.program_id(2) == pl.num_programs(2) - 1)
    def _():
        o_ref[...] = acc_ref[...].astype(o_ref.dtype)


def pallas_matmul(x, w, *, tm=256, tn=256, tk=512):
    m, k = x.shape
    k2, n = w.shape
    assert k == k2
    tm, tn, tk = _fit(m, tm), _fit(n, tn), _fit(k, tk)
    return pl.pallas_call(
        _matmul_kernel,
        out_shape=jax.ShapeDtypeStruct((m, n), x.dtype),
        grid=(m // tm, n // tn, k // tk),
        in_specs=[pl.BlockSpec((tm, tk), lambda i, j, kk: (i, kk)),
                  pl.BlockSpec((tk, tn), lambda i, j, kk: (kk, j))],
        out_specs=pl.BlockSpec((tm, tn), lambda i, j, kk: (i, j)),
        scratch_shapes=[pltpu.VMEM((tm, tn), jnp.float32)],
        compiler_params=pltpu.CompilerParams(
            dimension_semantics=("parallel", "parallel", "arbitrary"),
            vmem_limit_bytes=_VMEM_LIMIT),
    )(x, w)


# ----------------------------------------------------------------------------
# Kernel 2: fused QKV split + RoPE + relayout.
# Reads the fused GEMM output (B, S, (Hq+2*Hkv)*D) once and writes:
#   q: (B, S, Hkv, n_rep, D)  RoPE'd, pre-scaled by 1/sqrt(D)
#   k: (B, Hkv, S, D)         RoPE'd
#   v: (B, Hkv, S, D)
# Single HBM round-trip; replaces the XLA slices/transposes + standalone K-RoPE.
# ----------------------------------------------------------------------------
def _qkv_rope_split_kernel(qkv_ref, cos_ref, sin_ref, q_ref, k_ref, v_ref, *,
                           num_heads, num_kv_heads, head_dim, scale):
    half = head_dim // 2
    n_rep = num_heads // num_kv_heads
    # cos/sin come from concat(freqs, freqs): the two halves are identical.
    c = cos_ref[:, :half].astype(jnp.float32)            # (ts, half)
    s = sin_ref[:, :half].astype(jnp.float32)

    def rope(xh):                                         # (ts, D) -> (ts, D) in f32
        x = xh.astype(jnp.float32)
        x1 = x[:, :half]
        x2 = x[:, half:]
        # x*cos + rotate_half(x)*sin, per half (rotate_half(x) = concat(-x2, x1))
        return jnp.concatenate([x1 * c - x2 * s, x2 * c + x1 * s], axis=-1)

    # Q heads: RoPE + fold in 1/sqrt(D); target layout (ts, Hkv, n_rep, D).
    for h in range(num_heads):
        col = h * head_dim
        qh = rope(qkv_ref[:, col:col + head_dim]) * scale
        q_ref[:, h // n_rep, h % n_rep, :] = qh.astype(q_ref.dtype)

    # K heads: RoPE; target layout (Hkv, ts, D).
    k0 = num_heads * head_dim
    for h in range(num_kv_heads):
        col = k0 + h * head_dim
        k_ref[h, :, :] = rope(qkv_ref[:, col:col + head_dim]).astype(k_ref.dtype)

    # V heads: plain relayout; target layout (Hkv, ts, D).
    v0 = (num_heads + num_kv_heads) * head_dim
    for h in range(num_kv_heads):
        col = v0 + h * head_dim
        v_ref[h, :, :] = qkv_ref[:, col:col + head_dim]


def pallas_qkv_rope_split(qkv, cos, sin, num_heads, num_kv_heads, head_dim, *, ts=256):
    B, S, C = qkv.shape
    Hkv = num_kv_heads
    n_rep = num_heads // num_kv_heads
    ts = _fit(S, ts)
    scale = 1.0 / math.sqrt(head_dim)
    kernel = partial(_qkv_rope_split_kernel, num_heads=num_heads,
                     num_kv_heads=num_kv_heads, head_dim=head_dim, scale=scale)
    q, k, v = pl.pallas_call(
        kernel,
        out_shape=(jax.ShapeDtypeStruct((B, S, Hkv, n_rep, head_dim), qkv.dtype),
                   jax.ShapeDtypeStruct((B, Hkv, S, head_dim), qkv.dtype),
                   jax.ShapeDtypeStruct((B, Hkv, S, head_dim), qkv.dtype)),
        grid=(B, S // ts),
        in_specs=[pl.BlockSpec((None, ts, C), lambda b, si: (b, si, 0)),
                  pl.BlockSpec((ts, head_dim), lambda b, si: (si, 0)),
                  pl.BlockSpec((ts, head_dim), lambda b, si: (si, 0))],
        out_specs=(pl.BlockSpec((None, ts, Hkv, n_rep, head_dim),
                                lambda b, si: (b, si, 0, 0, 0)),
                   pl.BlockSpec((None, Hkv, ts, head_dim),
                                lambda b, si: (b, 0, si, 0)),
                   pl.BlockSpec((None, Hkv, ts, head_dim),
                                lambda b, si: (b, 0, si, 0))),
        compiler_params=pltpu.CompilerParams(
            dimension_semantics=("parallel", "parallel"),
            vmem_limit_bytes=_VMEM_LIMIT),
    )(qkv, cos, sin)
    return q, k, v


# ----------------------------------------------------------------------------
# Kernel 3: GQA flash attention with online softmax.
#   grid = (B, Hkv, S//tq, S//tk), kv axis last ("arbitrary").
#   Q comes in pre-RoPE'd and pre-scaled in the compute dtype; scores stay
#   (tq, n_rep, tk) so mask/bias are broadcast (no tiling) and the accumulator
#   matches the (B, S, Hkv, n_rep, D) output block directly (no reshapes).
# ----------------------------------------------------------------------------
def _flash_attn_kernel(*refs, tq, tk, causal, has_mask):
    if has_mask:
        q_ref, k_ref, v_ref, mask_ref, o_ref, m_s, l_s, acc_s = refs
    else:
        q_ref, k_ref, v_ref, o_ref, m_s, l_s, acc_s = refs
        mask_ref = None

    qi = pl.program_id(2)
    ki = pl.program_id(3)

    @pl.when(ki == 0)
    def _init():
        m_s[...] = jnp.full(m_s.shape, -jnp.inf, jnp.float32)
        l_s[...] = jnp.zeros(l_s.shape, jnp.float32)
        acc_s[...] = jnp.zeros(acc_s.shape, jnp.float32)

    def _body():
        q = q_ref[...]                                   # (tq, n_rep, D), compute dtype
        k = k_ref[...]                                   # (tk, D)
        v = v_ref[...]                                   # (tk, D)

        # s[i, r, j] = sum_d q[i, r, d] * k[j, d]   (f32 accumulation on MXU)
        s = lax.dot_general(q, k, (((2,), (1,)), ((), ())),
                            preferred_element_type=jnp.float32)   # (tq, n_rep, tk)

        if has_mask:
            s = s + mask_ref[...].astype(jnp.float32)[:, None, :]   # broadcast over n_rep
        if causal:
            # TODO(synk): bias could be skipped on fully-visible (non-diagonal) tiles.
            q_pos = qi * tq + lax.broadcasted_iota(jnp.int32, (tq, 1, tk), 0)
            k_pos = ki * tk + lax.broadcasted_iota(jnp.int32, (tq, 1, tk), 2)
            s = s + jnp.where(q_pos >= k_pos, 0.0, -1e9)            # broadcast over n_rep

        # online-softmax update (all f32)
        m_prev = m_s[...]
        m_new = jnp.maximum(m_prev, jnp.max(s, axis=-1, keepdims=True))
        alpha = jnp.exp(m_prev - m_new)
        p = jnp.exp(s - m_new)
        l_s[...] = alpha * l_s[...] + jnp.sum(p, axis=-1, keepdims=True)
        acc_s[...] = alpha * acc_s[...] + lax.dot_general(
            p.astype(v.dtype), v, (((2,), (0,)), ((), ())),
            preferred_element_type=jnp.float32)
        m_s[...] = m_new

    if causal:
        # Skip kv tiles that are entirely above the diagonal (fully masked).
        @pl.when(ki * tk < (qi + 1) * tq)
        def _():
            _body()
    else:
        _body()

    @pl.when(ki == pl.num_programs(3) - 1)
    def _finish():
        inv_l = pl.reciprocal(l_s[...], approx=True)
        o_ref[...] = (acc_s[...] * inv_l).astype(o_ref.dtype)


def pallas_attention(q, k, v, mask, *, causal, tq=256, tk=256):
    B, S, Hkv, n_rep, D = q.shape
    tq, tk = _fit(S, tq), _fit(S, tk)
    nq, nk = S // tq, S // tk
    has_mask = mask is not None

    kernel = partial(_flash_attn_kernel, tq=tq, tk=tk, causal=causal, has_mask=has_mask)

    in_specs = [
        pl.BlockSpec((None, tq, None, n_rep, D), lambda b, g, qi, ki: (b, qi, g, 0, 0)),  # q
        pl.BlockSpec((None, None, tk, D), lambda b, g, qi, ki: (b, g, ki, 0)),            # k
        pl.BlockSpec((None, None, tk, D), lambda b, g, qi, ki: (b, g, ki, 0)),            # v
    ]
    operands = [q, k, v]
    if has_mask:
        in_specs.append(
            pl.BlockSpec((None, None, tq, tk), lambda b, g, qi, ki: (b, 0, qi, ki)))      # additive mask
        operands.append(mask)

    return pl.pallas_call(
        kernel,
        out_shape=jax.ShapeDtypeStruct((B, S, Hkv, n_rep, D), q.dtype),
        grid=(B, Hkv, nq, nk),
        in_specs=in_specs,
        out_specs=pl.BlockSpec((None, tq, None, n_rep, D),
                               lambda b, g, qi, ki: (b, qi, g, 0, 0)),
        scratch_shapes=[
            pltpu.VMEM((tq, n_rep, 1), jnp.float32),   # running max m
            pltpu.VMEM((tq, n_rep, 1), jnp.float32),   # running sum l
            pltpu.VMEM((tq, n_rep, D), jnp.float32),   # output accumulator
        ],
        compiler_params=pltpu.CompilerParams(
            dimension_semantics=("parallel", "parallel", "parallel", "arbitrary"),
            vmem_limit_bytes=_VMEM_LIMIT),
    )(*operands)


# ----------------------------------------------------------------------------
# RoPE tables (host side, mirrors LlamaRotaryEmbedding with rope_scaling=None).
# ----------------------------------------------------------------------------
def rope_tables(seq_len, head_dim, position_ids, base=10000.0):
    inv_freq = 1.0 / (base ** (jnp.arange(0, head_dim, 2, dtype=jnp.float32) / head_dim))
    t = jnp.arange(seq_len, dtype=jnp.float32)
    freqs = jnp.einsum("i,j->ij", t, inv_freq)
    emb = jnp.concatenate([freqs, freqs], axis=-1)            # (S, D)
    # TODO(synk): per-batch (B, S) position_ids and linear/dynamic rope_scaling
    # variants only change these host-side tables; not exercised here.
    return jnp.cos(emb)[position_ids], jnp.sin(emb)[position_ids]


# ----------------------------------------------------------------------------
# Forward (mirrors LlamaAttention.forward with pretraining_tp == 1,
# past_key_value=None, output_attentions=False).
# ----------------------------------------------------------------------------
def llama_attention_forward(hidden_states, attention_mask, position_ids, params,
                            num_heads, num_kv_heads, *, causal=False):
    B, S, H = hidden_states.shape
    D = H // num_heads

    # 1) fused q/k/v projection: one tiled GEMM over the pre-concatenated weight.
    qkv = pallas_matmul(hidden_states.reshape(B * S, H), params["wqkv"])
    qkv = qkv.reshape(B, S, -1)                               # free reshape

    # 2) fused split + RoPE + relayout (single HBM round-trip, no XLA transposes).
    cos, sin = rope_tables(S, D, position_ids)
    q, k, v = pallas_qkv_rope_split(qkv, cos, sin, num_heads, num_kv_heads, D)

    mask = None
    if attention_mask is not None:
        mask = attention_mask.astype(hidden_states.dtype)

    # 3) GQA flash attention; output already in (B, S, Hkv, n_rep, D) layout.
    attn = pallas_attention(q, k, v, mask, causal=causal)

    # 4) output projection; the reshape below is free (layout is (B, S, Hq*D)).
    out = pallas_matmul(attn.reshape(B * S, num_heads * D), params["wo"])
    # TODO(synk): past_key_value / use_cache concat and pretraining_tp > 1 sliced
    # projections are not implemented; attn weights are never materialized
    # (flash path), so output_attentions=True has no equivalent here.
    return out.reshape(B, S, H)


# ----------------------------------------------------------------------------
# Pure-JAX reference (straight transcription of the PyTorch forward).
# ----------------------------------------------------------------------------
def reference_forward(hidden_states, attention_mask, position_ids, params,
                      num_heads, num_kv_heads):
    B, S, H = hidden_states.shape
    D = H // num_heads
    n_rep = num_heads // num_kv_heads

    q = hidden_states @ params["wq"]
    k = hidden_states @ params["wk"]
    v = hidden_states @ params["wv"]
    q = q.reshape(B, S, num_heads, D).transpose(0, 2, 1, 3)
    k = k.reshape(B, S, num_kv_heads, D).transpose(0, 2, 1, 3)
    v = v.reshape(B, S, num_kv_heads, D).transpose(0, 2, 1, 3)

    cos, sin = rope_tables(S, D, position_ids)
    cos = cos[None, None]
    sin = sin[None, None]

    q = q * cos + _rotate_half(q) * sin
    k = k * cos + _rotate_half(k) * sin

    k = jnp.repeat(k, n_rep, axis=1)
    v = jnp.repeat(v, n_rep, axis=1)

    s = jnp.einsum("bhqd,bhkd->bhqk", q, k) / math.sqrt(D)
    s = s + attention_mask
    p = jax.nn.softmax(s.astype(jnp.float32), axis=-1)
    o = jnp.einsum("bhqk,bhkd->bhqd", p, v)
    o = o.transpose(0, 2, 1, 3).reshape(B, S, H)
    return o @ params["wo"]


if __name__ == "__main__":
    # Small config consistent with the module: hidden=32, heads=4, head_dim=8, kv_heads=2 (GQA).
    B, S, H = 2, 8, 32
    num_heads, num_kv_heads = 4, 2
    D = H // num_heads

    key = jax.random.PRNGKey(0)
    k0, k1, k2, k3, k4 = jax.random.split(key, 5)

    params = {
        # stored as (in_features, out_features) == PyTorch weight.T
        "wq": 0.05 * jax.random.normal(k0, (H, num_heads * D), dtype=jnp.float32),
        "wk": 0.05 * jax.random.normal(k1, (H, num_kv_heads * D), dtype=jnp.float32),
        "wv": 0.05 * jax.random.normal(k2, (H, num_kv_heads * D), dtype=jnp.float32),
        "wo": 0.05 * jax.random.normal(k3, (num_heads * D, H), dtype=jnp.float32),
    }
    # fused QKV weight: built ONCE at weight-load time (hoisted out of the forward).
    params["wqkv"] = jnp.concatenate([params["wq"], params["wk"], params["wv"]], axis=1)

    hidden_states = jax.random.normal(k4, (B, S, H), dtype=jnp.float32)
    position_ids = jnp.arange(S, dtype=jnp.int32)

    # Causal additive mask, shape (B, 1, S, S): 0 on allowed, large negative elsewhere.
    causal_ok = jnp.tril(jnp.ones((S, S), dtype=bool))
    attention_mask = jnp.where(causal_ok, 0.0, -1e9).astype(jnp.float32)
    attention_mask = jnp.broadcast_to(attention_mask[None, None], (B, 1, S, S))

    ref = reference_forward(hidden_states, attention_mask, position_ids,
                            params, num_heads, num_kv_heads)

    # 1) fast path: causal mask generated in-kernel (no (B,1,S,S) mask traffic, tile skip).
    out_causal = llama_attention_forward(hidden_states, None, position_ids,
                                         params, num_heads, num_kv_heads, causal=True)
    out_causal = jax.block_until_ready(out_causal)
    assert out_causal.shape == (B, S, H)
    assert jnp.allclose(out_causal, ref, atol=2e-3, rtol=2e-3), \
        float(jnp.max(jnp.abs(out_causal - ref)))

    # 2) generic path: explicit additive attention_mask input (module semantics).
    out_masked = llama_attention_forward(hidden_states, attention_mask, position_ids,
                                         params, num_heads, num_kv_heads, causal=False)
    out_masked = jax.block_until_ready(out_masked)
    assert jnp.allclose(out_masked, ref, atol=2e-3, rtol=2e-3), \
        float(jnp.max(jnp.abs(out_masked - ref)))

    # 3) bf16 operands (MXU-friendly) with f32 accumulation / f32 softmax.
    params_bf16 = {name: w.astype(jnp.bfloat16) for name, w in params.items()}
    out_bf16 = llama_attention_forward(hidden_states.astype(jnp.bfloat16), None,
                                       position_ids, params_bf16,
                                       num_heads, num_kv_heads, causal=True)
    out_bf16 = jax.block_until_ready(out_bf16)
    assert jnp.allclose(out_bf16.astype(jnp.float32), ref, atol=5e-2, rtol=5e-2), \
        float(jnp.max(jnp.abs(out_bf16.astype(jnp.float32) - ref)))

    print("KERNEL_OK")
</pallas_src>

<mosaic_0001>
module attributes {stable_mosaic.version = 11 : i64} {
  func.func @_matmul_kernel(%arg0: i32, %arg1: i32, %arg2: i32, %arg3: memref<16x32xf32, #tpu.memory_space<vmem>>, %arg4: memref<32x64xf32, #tpu.memory_space<vmem>>, %arg5: memref<16x64xf32, #tpu.memory_space<vmem>>, %arg6: memref<16x64xf32, #tpu.memory_space<vmem>>) attributes {dimension_semantics = [#tpu.dimension_semantics<parallel>, #tpu.dimension_semantics<parallel>, #tpu.dimension_semantics<arbitrary>], iteration_bounds = array<i64: 1, 1, 1>, scalar_prefetch = 0 : i64, scratch_operands = 1 : i64, tpu.core_type = #tpu.core_type<tc>, window_params = [{transform_indices = @transform_0, window_bounds = array<i64: 16, 32>}, {transform_indices = @transform_1, window_bounds = array<i64: 32, 64>}, {transform_indices = @transform_2, window_bounds = array<i64: 16, 64>}]} {
    %c0_i32 = arith.constant 0 : i32
    %0 = arith.cmpi eq, %arg2, %c0_i32 : i32
    %1 = arith.extui %0 : i1 to i32
    %c0_i32_0 = arith.constant 0 : i32
    %2 = arith.cmpi ne, %1, %c0_i32_0 : i32
    scf.if %2 {
      %cst_10 = arith.constant 0.000000e+00 : f32
      %12 = vector.broadcast %cst_10 : f32 to vector<16x64xf32>
      %c0_11 = arith.constant 0 : index
      %c0_12 = arith.constant 0 : index
      %13 = vector.load %arg6[%c0_11, %c0_12] : memref<16x64xf32, #tpu.memory_space<vmem>>, vector<16x64xf32>
      tpu.vector_store %arg6[%c0_11, %c0_12], %12 {strides = array<i32>} : memref<16x64xf32, #tpu.memory_space<vmem>>, vector<16x64xf32>,
    } else {
    }
    %c0 = arith.constant 0 : index
    %c0_1 = arith.constant 0 : index
    %3 = vector.load %arg6[%c0, %c0_1] : memref<16x64xf32, #tpu.memory_space<vmem>>, vector<16x64xf32>
    %c0_2 = arith.constant 0 : index
    %c0_3 = arith.constant 0 : index
    %4 = vector.load %arg3[%c0_2, %c0_3] : memref<16x32xf32, #tpu.memory_space<vmem>>, vector<16x32xf32>
    %c0_4 = arith.constant 0 : index
    %c0_5 = arith.constant 0 : index
    %5 = vector.load %arg4[%c0_4, %c0_5] : memref<32x64xf32, #tpu.memory_space<vmem>>, vector<32x64xf32>
    %cst = arith.constant dense<0.000000e+00> : vector<16x64xf32>
    %6 = tpu.matmul %4, %5, %cst {dimension_numbers = #tpu.dot_dimension_numbers<[1], [0], [0], [1], [0, 0, 1, 1], [], []>} : vector<16x32xf32>, vector<32x64xf32>, vector<16x64xf32> -> vector<16x64xf32>
    %7 = arith.addf %3, %6 : vector<16x64xf32>
    %c0_6 = arith.constant 0 : index
    %c0_7 = arith.constant 0 : index
    %8 = vector.load %arg6[%c0_6, %c0_7] : memref<16x64xf32, #tpu.memory_space<vmem>>, vector<16x64xf32>
    tpu.vector_store %arg6[%c0_6, %c0_7], %7 {strides = array<i32>} : memref<16x64xf32, #tpu.memory_space<vmem>>, vector<16x64xf32>,
    %c0_i32_8 = arith.constant 0 : i32
    %9 = arith.cmpi eq, %arg2, %c0_i32_8 : i32
    %10 = arith.extui %9 : i1 to i32
    %c0_i32_9 = arith.constant 0 : i32
    %11 = arith.cmpi ne, %10, %c0_i32_9 : i32
    scf.if %11 {
      %c0_10 = arith.constant 0 : index
      %c0_11 = arith.constant 0 : index
      %12 = vector.load %arg6[%c0_10, %c0_11] : memref<16x64xf32, #tpu.memory_space<vmem>>, vector<16x64xf32>
      %c0_12 = arith.constant 0 : index
      %c0_13 = arith.constant 0 : index
      %13 = vector.load %arg5[%c0_12, %c0_13] : memref<16x64xf32, #tpu.memory_space<vmem>>, vector<16x64xf32>
      tpu.vector_store %arg5[%c0_12, %c0_13], %12 {strides = array<i32>} : memref<16x64xf32, #tpu.memory_space<vmem>>, vector<16x64xf32>,
    } else {
    }
    return
  }
  func.func @transform_0(%arg0: i32, %arg1: i32, %arg2: i32) -> (i32, i32) {
    %c0_i32 = arith.constant 0 : i32
    return %arg0, %arg2 : i32, i32
  }
  func.func @transform_1(%arg0: i32, %arg1: i32, %arg2: i32) -> (i32, i32) {
    %c0_i32 = arith.constant 0 : i32
    return %arg2, %arg1 : i32, i32
  }
  func.func @transform_2(%arg0: i32, %arg1: i32, %arg2: i32) -> (i32, i32) {
    %c0_i32 = arith.constant 0 : i32
    return %arg0, %arg1 : i32, i32
  }
}

</mosaic_0001>

<bundles_post_ra>
// kernel: tpu_custom_call.1
= control target key start
LH: loop header
LB: loop body
LE: loop exit
PB: predicated region body
PF: predicated region fallthrough
CT: control target
= control target key end

     0   :  { %7 = vsyncpa [#allocation4], 0  ;;  %s344_s0 = inlined_call_operand.hbm [shape: f32[16,32], index: 0, kind: input, shape index: {}]   ;;  %s345_s1 = inlined_call_operand.hbm [shape: f32[32,64], index: 1, kind: input, shape index: {}]   ;;  %s346_s2 = inlined_call_operand.hbm [shape: f32[16,64], index: 2, kind: output, shape index: {}]  }
   0x1   :  { %8 = vsyncpa [#allocation7], 0 }
   0x2   :  { %9 = vsyncpa [#allocation5], 0  ;;  %s272_s9 = smov [#allocation3]   ;;  %s200_s13 = scalar_lea.hbm %s344_s0, 256 }
   0x3   :  { %s15_s10 = sshll.u32 %s272_s9, 4  ;;  %p201_p0 = scmp.ne.s32.totalorder %s344_s0, %s200_s13  ;;  %s16_s10 = int_to_ptr.vmem [resolvable:$true] %s15_s10 }
   0x4   :  { %p204_p1 = scmp.lt.u32.totalorder %s200_s13, %s344_s0 }
   0x6   :  { %p206_p2 = pnand %p204_p1, %p201_p0 }
   0x8   :  { %209 = shalt.err (!%p206_p2)
}
   0x9   :  { %s210_s18 = scalar_lea.vmem %s16_s10, 256  ;;  %p215_p4 = scmp.lt.s32.totalorder %s16_s10, %s16_s10 }
   0xa   :  { %p211_p3 = scmp.ne.s32.totalorder %s16_s10, %s210_s18  ;;  %p216_p5 = scmp.lt.s32.totalorder %s210_s18, %s210_s18 }
   0xc   :  { %p217_p6 = por %p216_p5, %p215_p4 }
   0xe   :  { %p218_p7 = pnand %p217_p6, %p211_p3 }
  0x10   :  { %221 = shalt.err (!%p218_p7)
}
  0x11   :  { %s273_s19 = smov 128   ;;  %s274_s20 = smov 8  }
  0x12   :  { %21 = dma.hbm_to_vmem [thread:$0]  %s344_s0, 256, %s16_s10, [#allocation4], %s273_s19, %s273_s19, %s274_s20  }
  0x13   :  { %s275_s23 = smov [#allocation6]   ;;  %s222_s27 = scalar_lea.hbm %s345_s1, 512 }
  0x14   :  { %s27_s24 = sshll.u32 %s275_s23, 4  ;;  %p223_p8 = scmp.ne.s32.totalorder %s345_s1, %s222_s27  ;;  %s28_s24 = int_to_ptr.vmem [resolvable:$true] %s27_s24 }
  0x15   :  { %p226_p9 = scmp.lt.u32.totalorder %s222_s27, %s345_s1 }
  0x17   :  { %p228_p10 = pnand %p226_p9, %p223_p8 }
  0x19   :  { %231 = shalt.err (!%p228_p10)
}
  0x1a   :  { %s232_s4 = scalar_lea.vmem %s28_s24, 512  ;;  %p237_p12 = scmp.lt.s32.totalorder %s28_s24, %s28_s24 }
  0x1b   :  { %p233_p11 = scmp.ne.s32.totalorder %s28_s24, %s232_s4  ;;  %p238_p13 = scmp.lt.s32.totalorder %s232_s4, %s232_s4 }
  0x1d   :  { %p239_p0 = por %p238_p13, %p237_p12 }
  0x1f   :  { %p240_p1 = pnand %p239_p0, %p233_p11 }
  0x21   :  { %243 = shalt.err (!%p240_p1)
}
  0x22   :  { %33 = dma.hbm_to_vmem [thread:$0]  %s345_s1, 512, %s28_s24, [#allocation7], %s273_s19, %s273_s19, %s274_s20  }
  0x23   :  { %266 = dma.done.wait [#allocation4], 256  }
  0x24   :  { %267 = vsyncadd [#allocation4], 4294967040 }
  0x25   :  { %268 = dma.done.wait [#allocation7], 512  }
  0x26   :  { %269 = vsyncadd [#allocation7], 4294966784  ;;  %vm44_vm0 = vcmask 523264   ;;  %v276_v0 = vmov 0.0   ;;  %vm55_vm1 = vcmask 261120   ;;  %v51_v1 = vld [vmem:[#allocation6] sm:$0xff] }
  0x27   :  { %46 = vst.msk [vmem:[#allocation2 + $0x8] sm:$0xff] %vm44_vm0, %v276_v0  ;;  %45 = vst.msk [vmem:[#allocation2] sm:$0xff] %vm44_vm0, %v276_v0  ;;  %v52_v2 = vld [vmem:[#allocation6 + $0x8] sm:$0xff]  ;;  %v53_v3 = vld [vmem:[#allocation6 + $0x10] sm:$0xff]  ;;  %s277_s1 = smov [#allocation8]  }
  0x28   :  { %v186_v4 = vpack.c.bf16 %v52_v2, %v51_v1  ;;  %v54_v5 = vld [vmem:[#allocation6 + $0x18] sm:$0xff]  ;;  %v49_v6 = vld [vmem:[#allocation3] sm:$0xff]  ;;  %s154_s6 = sshll.u32 %s277_s1, 4  ;;  %s155_s6 = int_to_ptr.vmem [resolvable:$true] %s154_s6 }
  0x29   :  { %v190_v7 = vpack.c.bf16 %v54_v5, %v53_v3  ;;  %183 = vmatprep.mubr.msk.f32.mxu0 %vm55_vm1, %v49_v6  ;;  %v50_v8 = vld [vmem:[#allocation3 + $0x8] sm:$0xff]  ;;  %s244_s7 = scalar_lea.vmem %s155_s6, 256  ;;  %p249_p3 = scmp.lt.s32.totalorder %s155_s6, %s155_s6 }
  0x2a   :  { %187 = vmatprep.subr.bf16.mxu0 %v186_v4  ;;  %p245_p2 = scmp.ne.s32.totalorder %s155_s6, %s244_s7  ;;  %p250_p4 = scmp.lt.s32.totalorder %s244_s7, %s244_s7 }
  0x2b   :  { %189 = vmatpush3.bf16.msra.mxu0 %v186_v4 }
  0x2c   :  { %191 = vmatprep.subr.bf16.mxu0 %v190_v7  ;;  %p251_p5 = por %p250_p4, %p249_p3 }
  0x2e   :  { %v48_v9 = vld [vmem:[#allocation2 + $0x8] sm:$0xff]  ;;  %v47_v10 = vld [vmem:[#allocation2] sm:$0xff]  ;;  %p252_p6 = pnand %p251_p5, %p245_p2 }
  0x2f   :  { %193 = vmatpush3.bf16.msra.mxu0 %v190_v7 }
  0x32   :  { %184 = vmatmul.mubr.msk.f32.vlgmr.msra.gmra.mrb[0].mxu0 %vm55_vm1, %v50_v8 }
 0x105   :  { %v185_v11 = vpop.f32.mrb[0].mxu0 }
 0x106   :  { %v138_v12 = vadd.f32 %v185_v11, %v48_v9  ;;  %v128_v13 = vpop.f32.mrb[1].mxu0 }
 0x107   :  { %v137_v14 = vadd.f32 %v128_v13, %v47_v10 }
 0x108   :  { %141 = vst.msk [vmem:[#allocation2 + $0x8] sm:$0xff] %vm44_vm0, %v138_v12 }
 0x109   :  { %140 = vst.msk [vmem:[#allocation2] sm:$0xff] %vm44_vm0, %v137_v14 }
 0x10f   :  { %v146_v15 = vld [vmem:[#allocation2 + $0x8] sm:$0xff] }
 0x110   :  { %v145_v16 = vld [vmem:[#allocation2] sm:$0xff]  ;;  %148 = vst.msk [vmem:[#allocation8 + $0x8] sm:$0xff] %vm44_vm0, %v146_v15 }
 0x111   :  { %147 = vst.msk [vmem:[#allocation8] sm:$0xff] %vm44_vm0, %v145_v16 }
 0x112   :  { %255 = shalt.err (!%p252_p6)
}
 0x113   :  { %s256_s10 = scalar_lea.hbm %s346_s2, 256 }
 0x114   :  { %p257_p7 = scmp.ne.s32.totalorder %s346_s2, %s256_s10  ;;  %p260_p8 = scmp.lt.u32.totalorder %s256_s10, %s346_s2 }
 0x116   :  { %p262_p9 = pnand %p260_p8, %p257_p7 }
 0x118   :  { %265 = shalt.err (!%p262_p9)
}
 0x119   :  { %160 = dma.vmem_to_hbm [thread:$0]  %s155_s6, 256, %s346_s2, [#allocation5], %s273_s19, %s273_s19, %s274_s20  }
 0x11a   :  { %270 = dma.done.wait [#allocation5], 256  }
 0x11b   :  { %271 = vsyncadd [#allocation5], 4294967040 }
 0x11c   :  { %164 = vsyncpa [#allocation4], 1 }
 0x11d   :  { %165 = vsyncpa [#allocation7], 1 }
 0x11e   :  { %166 = vsyncpa [#allocation5], 1 }

</bundles_post_ra>
